<compile_context>
chip_gen: v5e
topology: v5e:2x2
jax: 0.10.0
libtpu: 0.0.40
codegen_flags: <defaults>
</compile_context>

<pallas_src>
import functools

import jax
import jax.numpy as jnp
from jax.experimental import pallas as pl
from jax.experimental.pallas import tpu as pltpu


def _round_up(x, m):
    return (x + m - 1) // m * m


# ---------------------------------------------------------------------------
# Fused Pallas kernel: the full conv+BN+ReLU chain for one image.
# Activation layout: (C_pad, H*W)  -> channels on sublanes, spatial on lanes.
# ---------------------------------------------------------------------------
def _fused_base_conv_kernel(x_ref, w_ref, scale_ref, bias_ref, mask_ref, o_ref,
                            *, num_layers, ksize, height, width, compute_dtype):
    hw = height * width
    pad = (ksize - 1) // 2

    act = x_ref[0]                                    # (C_pad, H*W), f32
    for layer in range(num_layers):                   # static unroll over layers
        # im2col: K*K shifted + boundary-masked copies of act, stacked along
        # sublanes (each copy is one aligned 8-row block -> cheap concat).
        taps = []
        tap = 0
        for kh in range(ksize):
            for kw in range(ksize):
                shift = (kh - pad) * width + (kw - pad)
                if shift == 0:
                    shifted = act
                else:
                    # out[f] = act[(f + shift) mod H*W]; wrapped positions are
                    # exactly the ones the boundary mask zeroes out, so this
                    # reproduces zero padding without any jnp.pad.
                    shifted = pltpu.roll(act, (-shift) % hw, axis=1)
                taps.append(shifted * mask_ref[tap])
                tap += 1
        patches = jnp.concatenate(taps, axis=0).astype(compute_dtype)
        # One MXU matmul per layer: (C_pad, K*K*C_pad) @ (K*K*C_pad, H*W).
        acc = jnp.dot(w_ref[layer], patches, preferred_element_type=jnp.float32)
        # Folded BatchNorm (eval) + ReLU: a single f32 fma + max.
        act = jnp.maximum(acc * scale_ref[layer] + bias_ref[layer], 0.0)

    o_ref[0] = act.astype(o_ref.dtype)                # full-width, unmasked store


# ---------------------------------------------------------------------------
# Wrapper: layout plumbing + parameter packing + the single pallas_call
# ---------------------------------------------------------------------------
def base_conv_forward(x_nchw, params, *, padding=1, compute_dtype=jnp.bfloat16):
    """Forward pass of BaseConv. Input/output are NCHW like PyTorch."""
    n, c_in, height, width = x_nchw.shape
    ksize = params[0]["w"].shape[0]
    assert padding == (ksize - 1) // 2, "fused kernel supports 'same' conv only"
    assert c_in == params[0]["w"].shape[2]
    c_out_final = params[-1]["w"].shape[3]
    num_layers = len(params)
    hw = height * width

    # Pad every layer's channel count to one shared sublane-aligned width.
    c_max = max([c_in] + [p["w"].shape[3] for p in params])
    c_pad = _round_up(max(c_max, 8), 8)
    kkc = ksize * ksize * c_pad

    # ---- layout plumbing (cheap, wrapper-side): NCHW -> (N, C_pad, H*W) ----
    x = x_nchw.reshape(n, c_in, hw).astype(jnp.float32)
    x = jnp.pad(x, ((0, 0), (0, c_pad - c_in), (0, 0)))

    # ---- pack per-layer params into stacked, channel-padded tensors ----
    # weight columns ordered (kh, kw, cin) to match the kernel's im2col rows.
    w_all = jnp.zeros((num_layers, c_pad, ksize, ksize, c_pad), jnp.float32)
    scale_all = jnp.zeros((num_layers, c_pad, 1), jnp.float32)
    bias_all = jnp.zeros((num_layers, c_pad, 1), jnp.float32)
    for l, p in enumerate(params):
        _, _, ci, co = p["w"].shape
        w_oi = jnp.transpose(p["w"], (3, 0, 1, 2))          # HWIO -> (O, Kh, Kw, I)
        w_all = w_all.at[l, :co, :, :, :ci].set(w_oi)
        scale_all = scale_all.at[l, :co, 0].set(p["scale"])
        bias_all = bias_all.at[l, :co, 0].set(p["bias"])
    w_all = w_all.reshape(num_layers, c_pad, kkc).astype(compute_dtype)

    # ---- boundary masks (replace explicit zero padding), built once ----
    pad_amt = (ksize - 1) // 2
    ii = jnp.arange(height).reshape(height, 1)
    jj = jnp.arange(width).reshape(1, width)
    masks = []
    for kh in range(ksize):
        for kw in range(ksize):
            dh, dw = kh - pad_amt, kw - pad_amt
            m = ((ii + dh >= 0) & (ii + dh < height) &
                 (jj + dw >= 0) & (jj + dw < width))
            masks.append(m.reshape(1, hw))
    mask_all = jnp.stack(masks).astype(jnp.float32)          # (K*K, 1, H*W)

    kernel = functools.partial(
        _fused_base_conv_kernel, num_layers=num_layers, ksize=ksize,
        height=height, width=width, compute_dtype=compute_dtype)

    out = pl.pallas_call(
        kernel,
        out_shape=jax.ShapeDtypeStruct((n, c_pad, hw), jnp.float32),
        grid=(n,),
        in_specs=[
            pl.BlockSpec((1, c_pad, hw), lambda b: (b, 0, 0)),              # x
            pl.BlockSpec((num_layers, c_pad, kkc), lambda b: (0, 0, 0)),    # weights
            pl.BlockSpec((num_layers, c_pad, 1), lambda b: (0, 0, 0)),      # BN scale
            pl.BlockSpec((num_layers, c_pad, 1), lambda b: (0, 0, 0)),      # BN bias
            pl.BlockSpec((ksize * ksize, 1, hw), lambda b: (0, 0, 0)),      # masks
        ],
        out_specs=pl.BlockSpec((1, c_pad, hw), lambda b: (b, 0, 0)),
        compiler_params=pltpu.CompilerParams(
            dimension_semantics=("parallel",)),
    )(x, w_all, scale_all, bias_all, mask_all)

    # ---- layout plumbing back: drop channel padding, restore NCHW ----
    return out[:, :c_out_final, :].reshape(n, c_out_final, height, width)


# ---------------------------------------------------------------------------
# BaseConv parameter construction (mirrors BaseConv.__init__ channel logic)
# ---------------------------------------------------------------------------
def make_base_conv_params(key, in_channel, out_channel, middle_channels=None,
                          kernel_size=3):
    middle_channels = list(middle_channels) if middle_channels else []
    if middle_channels:
        middle_channels.append(out_channel)
    list_channels = [in_channel] + middle_channels + [out_channel]

    params = []
    eps = 1e-5
    for in_c, out_c in zip(list_channels[:-1], list_channels[1:]):
        key, kw, kg, kb, km, kv = jax.random.split(key, 6)
        fan_in = in_c * kernel_size * kernel_size
        w = jax.random.normal(kw, (kernel_size, kernel_size, in_c, out_c),
                              jnp.float32) * (1.0 / jnp.sqrt(fan_in))   # HWIO
        conv_bias = jnp.zeros((out_c,), jnp.float32)
        gamma = 1.0 + 0.1 * jax.random.normal(kg, (out_c,), jnp.float32)
        beta = 0.1 * jax.random.normal(kb, (out_c,), jnp.float32)
        running_mean = 0.1 * jax.random.normal(km, (out_c,), jnp.float32)
        running_var = jnp.abs(jax.random.normal(kv, (out_c,), jnp.float32)) + 0.5
        # fold conv bias + BN(eval) into per-channel scale/bias
        scale = gamma / jnp.sqrt(running_var + eps)
        bias = beta + (conv_bias - running_mean) * scale
        params.append(dict(w=w, scale=scale, bias=bias))
    return params


# pure-JAX reference for verification
def _reference_forward(x_nchw, params, *, padding=1, compute_dtype=jnp.float32):
    x = x_nchw.astype(jnp.float32)
    for layer in params:
        y = jax.lax.conv_general_dilated(
            x.astype(compute_dtype), layer["w"].astype(compute_dtype),
            window_strides=(1, 1),
            padding=[(padding, padding), (padding, padding)],
            dimension_numbers=("NCHW", "HWIO", "NCHW"),
            preferred_element_type=jnp.float32)
        y = y * layer["scale"].reshape(1, -1, 1, 1) + layer["bias"].reshape(1, -1, 1, 1)
        x = jnp.maximum(y, 0.0)
    return x


if __name__ == "__main__":
    key = jax.random.PRNGKey(0)
    kx, kp = jax.random.split(key)

    # BaseConv(in_channel=4, out_channel=8, middle_channels=[6]) ->
    #   conv(4->6)+BN+ReLU, conv(6->8)+BN+ReLU, conv(8->8)+BN+ReLU
    in_channel, out_channel, middle = 4, 8, [6]
    x = jax.random.normal(kx, (2, in_channel, 16, 16), jnp.float32)   # NCHW
    params = make_base_conv_params(kp, in_channel, out_channel, middle,
                                   kernel_size=3)

    # f32 MXU path: exact eval-mode semantics, checked tightly.
    fwd_f32 = jax.jit(functools.partial(base_conv_forward, padding=1,
                                        compute_dtype=jnp.float32))
    out_f32 = jax.block_until_ready(fwd_f32(x, params))
    ref_f32 = _reference_forward(x, params, padding=1, compute_dtype=jnp.float32)
    assert out_f32.shape == (2, out_channel, 16, 16), out_f32.shape
    assert jnp.allclose(out_f32, ref_f32, atol=5e-4, rtol=5e-4), "f32 mismatch"

    # bf16 MXU path (v6e/v7x fast path), checked against a matching bf16 reference.
    fwd_bf16 = jax.jit(functools.partial(base_conv_forward, padding=1,
                                         compute_dtype=jnp.bfloat16))
    out_bf16 = jax.block_until_ready(fwd_bf16(x, params))
    ref_bf16 = _reference_forward(x, params, padding=1, compute_dtype=jnp.bfloat16)
    assert jnp.allclose(out_bf16, ref_bf16, atol=2e-2, rtol=2e-2), "bf16 mismatch"

    print("KERNEL_OK")
</pallas_src>

<mosaic_0001>
module attributes {stable_mosaic.version = 11 : i64} {
  func.func @_fused_base_conv_kernel(%arg0: i32, %arg1: memref<1x8x256xf32, #tpu.memory_space<vmem>>, %arg2: memref<3x8x72xf32, #tpu.memory_space<vmem>>, %arg3: memref<3x8x1xf32, #tpu.memory_space<vmem>>, %arg4: memref<3x8x1xf32, #tpu.memory_space<vmem>>, %arg5: memref<9x1x256xf32, #tpu.memory_space<vmem>>, %arg6: memref<1x8x256xf32, #tpu.memory_space<vmem>>) attributes {dimension_semantics = [#tpu.dimension_semantics<parallel>], iteration_bounds = array<i64: 2>, scalar_prefetch = 0 : i64, scratch_operands = 0 : i64, tpu.core_type = #tpu.core_type<tc>, window_params = [{transform_indices = @transform_0, window_bounds = array<i64: 1, 8, 256>}, {pipeline_mode = #tpu.pipeline_mode<synchronous>, transform_indices = @transform_1, window_bounds = array<i64: 3, 8, 72>}, {pipeline_mode = #tpu.pipeline_mode<synchronous>, transform_indices = @transform_2, window_bounds = array<i64: 3, 8, 1>}, {pipeline_mode = #tpu.pipeline_mode<synchronous>, transform_indices = @transform_3, window_bounds = array<i64: 3, 8, 1>}, {pipeline_mode = #tpu.pipeline_mode<synchronous>, transform_indices = @transform_4, window_bounds = array<i64: 9, 1, 256>}, {transform_indices = @transform_5, window_bounds = array<i64: 1, 8, 256>}]} {
    %c0 = arith.constant 0 : index
    %c0_0 = arith.constant 0 : index
    %c0_1 = arith.constant 0 : index
    %0 = vector.load %arg1[%c0, %c0_0, %c0_1] : memref<1x8x256xf32, #tpu.memory_space<vmem>>, vector<1x8x256xf32>
    %1 = vector.shape_cast %0 : vector<1x8x256xf32> to vector<8x256xf32>
    %c17_i32 = arith.constant 17 : i32
    %2 = tpu.dynamic_rotate %1 by %c17_i32 dim 1 : vector<8x256xf32>, i32 -> vector<8x256xf32>
    %c0_2 = arith.constant 0 : index
    %c0_3 = arith.constant 0 : index
    %c0_4 = arith.constant 0 : index
    %3 = vector.load %arg5[%c0_2, %c0_3, %c0_4] : memref<9x1x256xf32, #tpu.memory_space<vmem>>, vector<1x1x256xf32>
    %4 = vector.shape_cast %3 : vector<1x1x256xf32> to vector<1x256xf32>
    %5 = vector.broadcast %4 : vector<1x256xf32> to vector<8x256xf32>
    %6 = arith.mulf %2, %5 : vector<8x256xf32>
    %c16_i32 = arith.constant 16 : i32
    %7 = tpu.dynamic_rotate %1 by %c16_i32 dim 1 : vector<8x256xf32>, i32 -> vector<8x256xf32>
    %c1 = arith.constant 1 : index
    %c0_5 = arith.constant 0 : index
    %c0_6 = arith.constant 0 : index
    %8 = vector.load %arg5[%c1, %c0_5, %c0_6] : memref<9x1x256xf32, #tpu.memory_space<vmem>>, vector<1x1x256xf32>
    %9 = vector.shape_cast %8 : vector<1x1x256xf32> to vector<1x256xf32>
    %10 = vector.broadcast %9 : vector<1x256xf32> to vector<8x256xf32>
    %11 = arith.mulf %7, %10 : vector<8x256xf32>
    %c15_i32 = arith.constant 15 : i32
    %12 = tpu.dynamic_rotate %1 by %c15_i32 dim 1 : vector<8x256xf32>, i32 -> vector<8x256xf32>
    %c2 = arith.constant 2 : index
    %c0_7 = arith.constant 0 : index
    %c0_8 = arith.constant 0 : index
    %13 = vector.load %arg5[%c2, %c0_7, %c0_8] : memref<9x1x256xf32, #tpu.memory_space<vmem>>, vector<1x1x256xf32>
    %14 = vector.shape_cast %13 : vector<1x1x256xf32> to vector<1x256xf32>
    %15 = vector.broadcast %14 : vector<1x256xf32> to vector<8x256xf32>
    %16 = arith.mulf %12, %15 : vector<8x256xf32>
    %c1_i32 = arith.constant 1 : i32
    %17 = tpu.dynamic_rotate %1 by %c1_i32 dim 1 : vector<8x256xf32>, i32 -> vector<8x256xf32>
    %c3 = arith.constant 3 : index
    %c0_9 = arith.constant 0 : index
    %c0_10 = arith.constant 0 : index
    %18 = vector.load %arg5[%c3, %c0_9, %c0_10] : memref<9x1x256xf32, #tpu.memory_space<vmem>>, vector<1x1x256xf32>
    %19 = vector.shape_cast %18 : vector<1x1x256xf32> to vector<1x256xf32>
    %20 = vector.broadcast %19 : vector<1x256xf32> to vector<8x256xf32>
    %21 = arith.mulf %17, %20 : vector<8x256xf32>
    %c4 = arith.constant 4 : index
    %c0_11 = arith.constant 0 : index
    %c0_12 = arith.constant 0 : index
    %22 = vector.load %arg5[%c4, %c0_11, %c0_12] : memref<9x1x256xf32, #tpu.memory_space<vmem>>, vector<1x1x256xf32>
    %23 = vector.shape_cast %22 : vector<1x1x256xf32> to vector<1x256xf32>
    %24 = vector.broadcast %23 : vector<1x256xf32> to vector<8x256xf32>
    %25 = arith.mulf %1, %24 : vector<8x256xf32>
    %c255_i32 = arith.constant 255 : i32
    %26 = tpu.dynamic_rotate %1 by %c255_i32 dim 1 : vector<8x256xf32>, i32 -> vector<8x256xf32>
    %c5 = arith.constant 5 : index
    %c0_13 = arith.constant 0 : index
    %c0_14 = arith.constant 0 : index
    %27 = vector.load %arg5[%c5, %c0_13, %c0_14] : memref<9x1x256xf32, #tpu.memory_space<vmem>>, vector<1x1x256xf32>
    %28 = vector.shape_cast %27 : vector<1x1x256xf32> to vector<1x256xf32>
    %29 = vector.broadcast %28 : vector<1x256xf32> to vector<8x256xf32>
    %30 = arith.mulf %26, %29 : vector<8x256xf32>
    %c241_i32 = arith.constant 241 : i32
    %31 = tpu.dynamic_rotate %1 by %c241_i32 dim 1 : vector<8x256xf32>, i32 -> vector<8x256xf32>
    %c6 = arith.constant 6 : index
    %c0_15 = arith.constant 0 : index
    %c0_16 = arith.constant 0 : index
    %32 = vector.load %arg5[%c6, %c0_15, %c0_16] : memref<9x1x256xf32, #tpu.memory_space<vmem>>, vector<1x1x256xf32>
    %33 = vector.shape_cast %32 : vector<1x1x256xf32> to vector<1x256xf32>
    %34 = vector.broadcast %33 : vector<1x256xf32> to vector<8x256xf32>
    %35 = arith.mulf %31, %34 : vector<8x256xf32>
    %c240_i32 = arith.constant 240 : i32
    %36 = tpu.dynamic_rotate %1 by %c240_i32 dim 1 : vector<8x256xf32>, i32 -> vector<8x256xf32>
    %c7 = arith.constant 7 : index
    %c0_17 = arith.constant 0 : index
    %c0_18 = arith.constant 0 : index
    %37 = vector.load %arg5[%c7, %c0_17, %c0_18] : memref<9x1x256xf32, #tpu.memory_space<vmem>>, vector<1x1x256xf32>
    %38 = vector.shape_cast %37 : vector<1x1x256xf32> to vector<1x256xf32>
    %39 = vector.broadcast %38 : vector<1x256xf32> to vector<8x256xf32>
    %40 = arith.mulf %36, %39 : vector<8x256xf32>
    %c239_i32 = arith.constant 239 : i32
    %41 = tpu.dynamic_rotate %1 by %c239_i32 dim 1 : vector<8x256xf32>, i32 -> vector<8x256xf32>
    %c8 = arith.constant 8 : index
    %c0_19 = arith.constant 0 : index
    %c0_20 = arith.constant 0 : index
    %42 = vector.load %arg5[%c8, %c0_19, %c0_20] : memref<9x1x256xf32, #tpu.memory_space<vmem>>, vector<1x1x256xf32>
    %43 = vector.shape_cast %42 : vector<1x1x256xf32> to vector<1x256xf32>
    %44 = vector.broadcast %43 : vector<1x256xf32> to vector<8x256xf32>
    %45 = arith.mulf %41, %44 : vector<8x256xf32>
    %46 = tpu.concatenate %6, %11, %16, %21, %25, %30, %35, %40, %45 in 0 : vector<8x256xf32>, vector<8x256xf32>, vector<8x256xf32>, vector<8x256xf32>, vector<8x256xf32>, vector<8x256xf32>, vector<8x256xf32>, vector<8x256xf32>, vector<8x256xf32> -> vector<72x256xf32>
    %c0_21 = arith.constant 0 : index
    %c0_22 = arith.constant 0 : index
    %c0_23 = arith.constant 0 : index
    %47 = vector.load %arg2[%c0_21, %c0_22, %c0_23] : memref<3x8x72xf32, #tpu.memory_space<vmem>>, vector<1x8x72xf32>
    %48 = vector.shape_cast %47 : vector<1x8x72xf32> to vector<8x72xf32>
    %cst = arith.constant dense<0.000000e+00> : vector<8x256xf32>
    %49 = tpu.matmul %48, %46, %cst {dimension_numbers = #tpu.dot_dimension_numbers<[1], [0], [0], [1], [0, 0, 1, 1], [], []>} : vector<8x72xf32>, vector<72x256xf32>, vector<8x256xf32> -> vector<8x256xf32>
    %c0_24 = arith.constant 0 : index
    %c0_25 = arith.constant 0 : index
    %c0_26 = arith.constant 0 : index
    %50 = vector.load %arg3[%c0_24, %c0_25, %c0_26] : memref<3x8x1xf32, #tpu.memory_space<vmem>>, vector<1x8x1xf32>
    %51 = vector.shape_cast %50 : vector<1x8x1xf32> to vector<8x1xf32>
    %52 = vector.broadcast %51 : vector<8x1xf32> to vector<8x256xf32>
    %53 = arith.mulf %49, %52 : vector<8x256xf32>
    %c0_27 = arith.constant 0 : index
    %c0_28 = arith.constant 0 : index
    %c0_29 = arith.constant 0 : index
    %54 = vector.load %arg4[%c0_27, %c0_28, %c0_29] : memref<3x8x1xf32, #tpu.memory_space<vmem>>, vector<1x8x1xf32>
    %55 = vector.shape_cast %54 : vector<1x8x1xf32> to vector<8x1xf32>
    %56 = vector.broadcast %55 : vector<8x1xf32> to vector<8x256xf32>
    %57 = arith.addf %53, %56 : vector<8x256xf32>
    %cst_30 = arith.constant 0.000000e+00 : f32
    %58 = vector.broadcast %cst_30 : f32 to vector<8x256xf32>
    %59 = arith.maximumf %57, %58 : vector<8x256xf32>
    %c17_i32_31 = arith.constant 17 : i32
    %60 = tpu.dynamic_rotate %59 by %c17_i32_31 dim 1 : vector<8x256xf32>, i32 -> vector<8x256xf32>
    %c0_32 = arith.constant 0 : index
    %c0_33 = arith.constant 0 : index
    %c0_34 = arith.constant 0 : index
    %61 = vector.load %arg5[%c0_32, %c0_33, %c0_34] : memref<9x1x256xf32, #tpu.memory_space<vmem>>, vector<1x1x256xf32>
    %62 = vector.shape_cast %61 : vector<1x1x256xf32> to vector<1x256xf32>
    %63 = vector.broadcast %62 : vector<1x256xf32> to vector<8x256xf32>
    %64 = arith.mulf %60, %63 : vector<8x256xf32>
    %c16_i32_35 = arith.constant 16 : i32
    %65 = tpu.dynamic_rotate %59 by %c16_i32_35 dim 1 : vector<8x256xf32>, i32 -> vector<8x256xf32>
    %c1_36 = arith.constant 1 : index
    %c0_37 = arith.constant 0 : index
    %c0_38 = arith.constant 0 : index
    %66 = vector.load %arg5[%c1_36, %c0_37, %c0_38] : memref<9x1x256xf32, #tpu.memory_space<vmem>>, vector<1x1x256xf32>
    %67 = vector.shape_cast %66 : vector<1x1x256xf32> to vector<1x256xf32>
    %68 = vector.broadcast %67 : vector<1x256xf32> to vector<8x256xf32>
    %69 = arith.mulf %65, %68 : vector<8x256xf32>
    %c15_i32_39 = arith.constant 15 : i32
    %70 = tpu.dynamic_rotate %59 by %c15_i32_39 dim 1 : vector<8x256xf32>, i32 -> vector<8x256xf32>
    %c2_40 = arith.constant 2 : index
    %c0_41 = arith.constant 0 : index
    %c0_42 = arith.constant 0 : index
    %71 = vector.load %arg5[%c2_40, %c0_41, %c0_42] : memref<9x1x256xf32, #tpu.memory_space<vmem>>, vector<1x1x256xf32>
    %72 = vector.shape_cast %71 : vector<1x1x256xf32> to vector<1x256xf32>
    %73 = vector.broadcast %72 : vector<1x256xf32> to vector<8x256xf32>
    %74 = arith.mulf %70, %73 : vector<8x256xf32>
    %c1_i32_43 = arith.constant 1 : i32
    %75 = tpu.dynamic_rotate %59 by %c1_i32_43 dim 1 : vector<8x256xf32>, i32 -> vector<8x256xf32>
    %c3_44 = arith.constant 3 : index
    %c0_45 = arith.constant 0 : index
    %c0_46 = arith.constant 0 : index
    %76 = vector.load %arg5[%c3_44, %c0_45, %c0_46] : memref<9x1x256xf32, #tpu.memory_space<vmem>>, vector<1x1x256xf32>
    %77 = vector.shape_cast %76 : vector<1x1x256xf32> to vector<1x256xf32>
    %78 = vector.broadcast %77 : vector<1x256xf32> to vector<8x256xf32>
    %79 = arith.mulf %75, %78 : vector<8x256xf32>
    %c4_47 = arith.constant 4 : index
    %c0_48 = arith.constant 0 : index
    %c0_49 = arith.constant 0 : index
    %80 = vector.load %arg5[%c4_47, %c0_48, %c0_49] : memref<9x1x256xf32, #tpu.memory_space<vmem>>, vector<1x1x256xf32>
    %81 = vector.shape_cast %80 : vector<1x1x256xf32> to vector<1x256xf32>
    %82 = vector.broadcast %81 : vector<1x256xf32> to vector<8x256xf32>
    %83 = arith.mulf %59, %82 : vector<8x256xf32>
    %c255_i32_50 = arith.constant 255 : i32
    %84 = tpu.dynamic_rotate %59 by %c255_i32_50 dim 1 : vector<8x256xf32>, i32 -> vector<8x256xf32>
    %c5_51 = arith.constant 5 : index
    %c0_52 = arith.constant 0 : index
    %c0_53 = arith.constant 0 : index
    %85 = vector.load %arg5[%c5_51, %c0_52, %c0_53] : memref<9x1x256xf32, #tpu.memory_space<vmem>>, vector<1x1x256xf32>
    %86 = vector.shape_cast %85 : vector<1x1x256xf32> to vector<1x256xf32>
    %87 = vector.broadcast %86 : vector<1x256xf32> to vector<8x256xf32>
    %88 = arith.mulf %84, %87 : vector<8x256xf32>
    %c241_i32_54 = arith.constant 241 : i32
    %89 = tpu.dynamic_rotate %59 by %c241_i32_54 dim 1 : vector<8x256xf32>, i32 -> vector<8x256xf32>
    %c6_55 = arith.constant 6 : index
    %c0_56 = arith.constant 0 : index
    %c0_57 = arith.constant 0 : index
    %90 = vector.load %arg5[%c6_55, %c0_56, %c0_57] : memref<9x1x256xf32, #tpu.memory_space<vmem>>, vector<1x1x256xf32>
    %91 = vector.shape_cast %90 : vector<1x1x256xf32> to vector<1x256xf32>
    %92 = vector.broadcast %91 : vector<1x256xf32> to vector<8x256xf32>
    %93 = arith.mulf %89, %92 : vector<8x256xf32>
    %c240_i32_58 = arith.constant 240 : i32
    %94 = tpu.dynamic_rotate %59 by %c240_i32_58 dim 1 : vector<8x256xf32>, i32 -> vector<8x256xf32>
    %c7_59 = arith.constant 7 : index
    %c0_60 = arith.constant 0 : index
    %c0_61 = arith.constant 0 : index
    %95 = vector.load %arg5[%c7_59, %c0_60, %c0_61] : memref<9x1x256xf32, #tpu.memory_space<vmem>>, vector<1x1x256xf32>
    %96 = vector.shape_cast %95 : vector<1x1x256xf32> to vector<1x256xf32>
    %97 = vector.broadcast %96 : vector<1x256xf32> to vector<8x256xf32>
    %98 = arith.mulf %94, %97 : vector<8x256xf32>
    %c239_i32_62 = arith.constant 239 : i32
    %99 = tpu.dynamic_rotate %59 by %c239_i32_62 dim 1 : vector<8x256xf32>, i32 -> vector<8x256xf32>
    %c8_63 = arith.constant 8 : index
    %c0_64 = arith.constant 0 : index
    %c0_65 = arith.constant 0 : index
    %100 = vector.load %arg5[%c8_63, %c0_64, %c0_65] : memref<9x1x256xf32, #tpu.memory_space<vmem>>, vector<1x1x256xf32>
    %101 = vector.shape_cast %100 : vector<1x1x256xf32> to vector<1x256xf32>
    %102 = vector.broadcast %101 : vector<1x256xf32> to vector<8x256xf32>
    %103 = arith.mulf %99, %102 : vector<8x256xf32>
    %104 = tpu.concatenate %64, %69, %74, %79, %83, %88, %93, %98, %103 in 0 : vector<8x256xf32>, vector<8x256xf32>, vector<8x256xf32>, vector<8x256xf32>, vector<8x256xf32>, vector<8x256xf32>, vector<8x256xf32>, vector<8x256xf32>, vector<8x256xf32> -> vector<72x256xf32>
    %c1_66 = arith.constant 1 : index
    %c0_67 = arith.constant 0 : index
    %c0_68 = arith.constant 0 : index
    %105 = vector.load %arg2[%c1_66, %c0_67, %c0_68] : memref<3x8x72xf32, #tpu.memory_space<vmem>>, vector<1x8x72xf32>
    %106 = vector.shape_cast %105 : vector<1x8x72xf32> to vector<8x72xf32>
    %cst_69 = arith.constant dense<0.000000e+00> : vector<8x256xf32>
    %107 = tpu.matmul %106, %104, %cst_69 {dimension_numbers = #tpu.dot_dimension_numbers<[1], [0], [0], [1], [0, 0, 1, 1], [], []>} : vector<8x72xf32>, vector<72x256xf32>, vector<8x256xf32> -> vector<8x256xf32>
    %c1_70 = arith.constant 1 : index
    %c0_71 = arith.constant 0 : index
    %c0_72 = arith.constant 0 : index
    %108 = vector.load %arg3[%c1_70, %c0_71, %c0_72] : memref<3x8x1xf32, #tpu.memory_space<vmem>>, vector<1x8x1xf32>
    %109 = vector.shape_cast %108 : vector<1x8x1xf32> to vector<8x1xf32>
    %110 = vector.broadcast %109 : vector<8x1xf32> to vector<8x256xf32>
    %111 = arith.mulf %107, %110 : vector<8x256xf32>
    %c1_73 = arith.constant 1 : index
    %c0_74 = arith.constant 0 : index
    %c0_75 = arith.constant 0 : index
    %112 = vector.load %arg4[%c1_73, %c0_74, %c0_75] : memref<3x8x1xf32, #tpu.memory_space<vmem>>, vector<1x8x1xf32>
    %113 = vector.shape_cast %112 : vector<1x8x1xf32> to vector<8x1xf32>
    %114 = vector.broadcast %113 : vector<8x1xf32> to vector<8x256xf32>
    %115 = arith.addf %111, %114 : vector<8x256xf32>
    %cst_76 = arith.constant 0.000000e+00 : f32
    %116 = vector.broadcast %cst_76 : f32 to vector<8x256xf32>
    %117 = arith.maximumf %115, %116 : vector<8x256xf32>
    %c17_i32_77 = arith.constant 17 : i32
    %118 = tpu.dynamic_rotate %117 by %c17_i32_77 dim 1 : vector<8x256xf32>, i32 -> vector<8x256xf32>
    %c0_78 = arith.constant 0 : index
    %c0_79 = arith.constant 0 : index
    %c0_80 = arith.constant 0 : index
    %119 = vector.load %arg5[%c0_78, %c0_79, %c0_80] : memref<9x1x256xf32, #tpu.memory_space<vmem>>, vector<1x1x256xf32>
    %120 = vector.shape_cast %119 : vector<1x1x256xf32> to vector<1x256xf32>
    %121 = vector.broadcast %120 : vector<1x256xf32> to vector<8x256xf32>
    %122 = arith.mulf %118, %121 : vector<8x256xf32>
    %c16_i32_81 = arith.constant 16 : i32
    %123 = tpu.dynamic_rotate %117 by %c16_i32_81 dim 1 : vector<8x256xf32>, i32 -> vector<8x256xf32>
    %c1_82 = arith.constant 1 : index
    %c0_83 = arith.constant 0 : index
    %c0_84 = arith.constant 0 : index
    %124 = vector.load %arg5[%c1_82, %c0_83, %c0_84] : memref<9x1x256xf32, #tpu.memory_space<vmem>>, vector<1x1x256xf32>
    %125 = vector.shape_cast %124 : vector<1x1x256xf32> to vector<1x256xf32>
    %126 = vector.broadcast %125 : vector<1x256xf32> to vector<8x256xf32>
    %127 = arith.mulf %123, %126 : vector<8x256xf32>
    %c15_i32_85 = arith.constant 15 : i32
    %128 = tpu.dynamic_rotate %117 by %c15_i32_85 dim 1 : vector<8x256xf32>, i32 -> vector<8x256xf32>
    %c2_86 = arith.constant 2 : index
    %c0_87 = arith.constant 0 : index
    %c0_88 = arith.constant 0 : index
    %129 = vector.load %arg5[%c2_86, %c0_87, %c0_88] : memref<9x1x256xf32, #tpu.memory_space<vmem>>, vector<1x1x256xf32>
    %130 = vector.shape_cast %129 : vector<1x1x256xf32> to vector<1x256xf32>
    %131 = vector.broadcast %130 : vector<1x256xf32> to vector<8x256xf32>
    %132 = arith.mulf %128, %131 : vector<8x256xf32>
    %c1_i32_89 = arith.constant 1 : i32
    %133 = tpu.dynamic_rotate %117 by %c1_i32_89 dim 1 : vector<8x256xf32>, i32 -> vector<8x256xf32>
    %c3_90 = arith.constant 3 : index
    %c0_91 = arith.constant 0 : index
    %c0_92 = arith.constant 0 : index
    %134 = vector.load %arg5[%c3_90, %c0_91, %c0_92] : memref<9x1x256xf32, #tpu.memory_space<vmem>>, vector<1x1x256xf32>
    %135 = vector.shape_cast %134 : vector<1x1x256xf32> to vector<1x256xf32>
    %136 = vector.broadcast %135 : vector<1x256xf32> to vector<8x256xf32>
    %137 = arith.mulf %133, %136 : vector<8x256xf32>
    %c4_93 = arith.constant 4 : index
    %c0_94 = arith.constant 0 : index
    %c0_95 = arith.constant 0 : index
    %138 = vector.load %arg5[%c4_93, %c0_94, %c0_95] : memref<9x1x256xf32, #tpu.memory_space<vmem>>, vector<1x1x256xf32>
    %139 = vector.shape_cast %138 : vector<1x1x256xf32> to vector<1x256xf32>
    %140 = vector.broadcast %139 : vector<1x256xf32> to vector<8x256xf32>
    %141 = arith.mulf %117, %140 : vector<8x256xf32>
    %c255_i32_96 = arith.constant 255 : i32
    %142 = tpu.dynamic_rotate %117 by %c255_i32_96 dim 1 : vector<8x256xf32>, i32 -> vector<8x256xf32>
    %c5_97 = arith.constant 5 : index
    %c0_98 = arith.constant 0 : index
    %c0_99 = arith.constant 0 : index
    %143 = vector.load %arg5[%c5_97, %c0_98, %c0_99] : memref<9x1x256xf32, #tpu.memory_space<vmem>>, vector<1x1x256xf32>
    %144 = vector.shape_cast %143 : vector<1x1x256xf32> to vector<1x256xf32>
    %145 = vector.broadcast %144 : vector<1x256xf32> to vector<8x256xf32>
    %146 = arith.mulf %142, %145 : vector<8x256xf32>
    %c241_i32_100 = arith.constant 241 : i32
    %147 = tpu.dynamic_rotate %117 by %c241_i32_100 dim 1 : vector<8x256xf32>, i32 -> vector<8x256xf32>
    %c6_101 = arith.constant 6 : index
    %c0_102 = arith.constant 0 : index
    %c0_103 = arith.constant 0 : index
    %148 = vector.load %arg5[%c6_101, %c0_102, %c0_103] : memref<9x1x256xf32, #tpu.memory_space<vmem>>, vector<1x1x256xf32>
    %149 = vector.shape_cast %148 : vector<1x1x256xf32> to vector<1x256xf32>
    %150 = vector.broadcast %149 : vector<1x256xf32> to vector<8x256xf32>
    %151 = arith.mulf %147, %150 : vector<8x256xf32>
    %c240_i32_104 = arith.constant 240 : i32
    %152 = tpu.dynamic_rotate %117 by %c240_i32_104 dim 1 : vector<8x256xf32>, i32 -> vector<8x256xf32>
    %c7_105 = arith.constant 7 : index
    %c0_106 = arith.constant 0 : index
    %c0_107 = arith.constant 0 : index
    %153 = vector.load %arg5[%c7_105, %c0_106, %c0_107] : memref<9x1x256xf32, #tpu.memory_space<vmem>>, vector<1x1x256xf32>
    %154 = vector.shape_cast %153 : vector<1x1x256xf32> to vector<1x256xf32>
    %155 = vector.broadcast %154 : vector<1x256xf32> to vector<8x256xf32>
    %156 = arith.mulf %152, %155 : vector<8x256xf32>
    %c239_i32_108 = arith.constant 239 : i32
    %157 = tpu.dynamic_rotate %117 by %c239_i32_108 dim 1 : vector<8x256xf32>, i32 -> vector<8x256xf32>
    %c8_109 = arith.constant 8 : index
    %c0_110 = arith.constant 0 : index
    %c0_111 = arith.constant 0 : index
    %158 = vector.load %arg5[%c8_109, %c0_110, %c0_111] : memref<9x1x256xf32, #tpu.memory_space<vmem>>, vector<1x1x256xf32>
    %159 = vector.shape_cast %158 : vector<1x1x256xf32> to vector<1x256xf32>
    %160 = vector.broadcast %159 : vector<1x256xf32> to vector<8x256xf32>
    %161 = arith.mulf %157, %160 : vector<8x256xf32>
    %162 = tpu.concatenate %122, %127, %132, %137, %141, %146, %151, %156, %161 in 0 : vector<8x256xf32>, vector<8x256xf32>, vector<8x256xf32>, vector<8x256xf32>, vector<8x256xf32>, vector<8x256xf32>, vector<8x256xf32>, vector<8x256xf32>, vector<8x256xf32> -> vector<72x256xf32>
    %c2_112 = arith.constant 2 : index
    %c0_113 = arith.constant 0 : index
    %c0_114 = arith.constant 0 : index
    %163 = vector.load %arg2[%c2_112, %c0_113, %c0_114] : memref<3x8x72xf32, #tpu.memory_space<vmem>>, vector<1x8x72xf32>
    %164 = vector.shape_cast %163 : vector<1x8x72xf32> to vector<8x72xf32>
    %cst_115 = arith.constant dense<0.000000e+00> : vector<8x256xf32>
    %165 = tpu.matmul %164, %162, %cst_115 {dimension_numbers = #tpu.dot_dimension_numbers<[1], [0], [0], [1], [0, 0, 1, 1], [], []>} : vector<8x72xf32>, vector<72x256xf32>, vector<8x256xf32> -> vector<8x256xf32>
    %c2_116 = arith.constant 2 : index
    %c0_117 = arith.constant 0 : index
    %c0_118 = arith.constant 0 : index
    %166 = vector.load %arg3[%c2_116, %c0_117, %c0_118] : memref<3x8x1xf32, #tpu.memory_space<vmem>>, vector<1x8x1xf32>
    %167 = vector.shape_cast %166 : vector<1x8x1xf32> to vector<8x1xf32>
    %168 = vector.broadcast %167 : vector<8x1xf32> to vector<8x256xf32>
    %169 = arith.mulf %165, %168 : vector<8x256xf32>
    %c2_119 = arith.constant 2 : index
    %c0_120 = arith.constant 0 : index
    %c0_121 = arith.constant 0 : index
    %170 = vector.load %arg4[%c2_119, %c0_120, %c0_121] : memref<3x8x1xf32, #tpu.memory_space<vmem>>, vector<1x8x1xf32>
    %171 = vector.shape_cast %170 : vector<1x8x1xf32> to vector<8x1xf32>
    %172 = vector.broadcast %171 : vector<8x1xf32> to vector<8x256xf32>
    %173 = arith.addf %169, %172 : vector<8x256xf32>
    %cst_122 = arith.constant 0.000000e+00 : f32
    %174 = vector.broadcast %cst_122 : f32 to vector<8x256xf32>
    %175 = arith.maximumf %173, %174 : vector<8x256xf32>
    %c0_123 = arith.constant 0 : index
    %c0_124 = arith.constant 0 : index
    %c0_125 = arith.constant 0 : index
    %176 = vector.load %arg6[%c0_123, %c0_124, %c0_125] : memref<1x8x256xf32, #tpu.memory_space<vmem>>, vector<1x8x256xf32>
    %177 = vector.shape_cast %176 : vector<1x8x256xf32> to vector<8x256xf32>
    %178 = vector.shape_cast %175 : vector<8x256xf32> to vector<1x8x256xf32>
    tpu.vector_store %arg6[%c0_123, %c0_124, %c0_125], %178 {strides = array<i32>} : memref<1x8x256xf32, #tpu.memory_space<vmem>>, vector<1x8x256xf32>,
    return
  }
  func.func @transform_0(%arg0: i32) -> (i32, i32, i32) {
    %c0_i32 = arith.constant 0 : i32
    %c0_i32_0 = arith.constant 0 : i32
    %c0_i32_1 = arith.constant 0 : i32
    return %arg0, %c0_i32, %c0_i32_0 : i32, i32, i32
  }
  func.func @transform_1(%arg0: i32) -> (i32, i32, i32) {
    %c0_i32 = arith.constant 0 : i32
    %c0_i32_0 = arith.constant 0 : i32
    %c0_i32_1 = arith.constant 0 : i32
    %c0_i32_2 = arith.constant 0 : i32
    return %c0_i32, %c0_i32_0, %c0_i32_1 : i32, i32, i32
  }
  func.func @transform_2(%arg0: i32) -> (i32, i32, i32) {
    %c0_i32 = arith.constant 0 : i32
    %c0_i32_0 = arith.constant 0 : i32
    %c0_i32_1 = arith.constant 0 : i32
    %c0_i32_2 = arith.constant 0 : i32
    return %c0_i32, %c0_i32_0, %c0_i32_1 : i32, i32, i32
  }
  func.func @transform_3(%arg0: i32) -> (i32, i32, i32) {
    %c0_i32 = arith.constant 0 : i32
    %c0_i32_0 = arith.constant 0 : i32
    %c0_i32_1 = arith.constant 0 : i32
    %c0_i32_2 = arith.constant 0 : i32
    return %c0_i32, %c0_i32_0, %c0_i32_1 : i32, i32, i32
  }
  func.func @transform_4(%arg0: i32) -> (i32, i32, i32) {
    %c0_i32 = arith.constant 0 : i32
    %c0_i32_0 = arith.constant 0 : i32
    %c0_i32_1 = arith.constant 0 : i32
    %c0_i32_2 = arith.constant 0 : i32
    return %c0_i32, %c0_i32_0, %c0_i32_1 : i32, i32, i32
  }
  func.func @transform_5(%arg0: i32) -> (i32, i32, i32) {
    %c0_i32 = arith.constant 0 : i32
    %c0_i32_0 = arith.constant 0 : i32
    %c0_i32_1 = arith.constant 0 : i32
    return %arg0, %c0_i32, %c0_i32_0 : i32, i32, i32
  }
}

</mosaic_0001>

<bundles_post_ra>
// kernel: base_conv_forward.1
= control target key start
LH: loop header
LB: loop body
LE: loop exit
PB: predicated region body
PF: predicated region fallthrough
CT: control target
= control target key end

     0   :  { %s847_s18 = smov 0   ;;  %s1197_s0 = inlined_call_operand.vmem [shape: f32[2,8,256], index: 0, kind: input, shape index: {}]   ;;  %s1198_s1 = inlined_call_operand.vmem [shape: f32[3,8,72], index: 1, kind: input, shape index: {}]   ;;  %s1199_s2 = inlined_call_operand.vmem [shape: f32[3,8,1], index: 2, kind: input, shape index: {}]   ;;  %s1200_s3 = inlined_call_operand.vmem [shape: f32[3,8,1], index: 3, kind: input, shape index: {}]   ;;  %s1201_s4 = inlined_call_operand.vmem [shape: f32[9,1,256], index: 4, kind: input, shape index: {}]   ;;  %s1202_s5 = inlined_call_operand.vmem [shape: f32[2,8,256], index: 5, kind: output, shape index: {}]  }
   0x1 LB: > { %s747_s19 = sadd.s32 4294967295, %s806_s18   ;;  %p751_p0 = scmp.ge.s32.totalorder %s806_s18, 1  ;;  %s806_s18 = sphi %s847_s18, %s15_s18  }
   0x2   : > { %p187_p1 = scmp.lt.s32.totalorder %s806_s18, 3 }
   0x4   : > { %p188_p2 = pnand %p751_p0, %p187_p1 }
   0x5   : > { %p215_p3 = scmp.lt.s32.totalorder (!%p188_p2), %s747_s19, 1  ;;  %s808_s24 = smov (!%p188_p2), 112  }
   0x6   : > { %191 = sbr.rel (%p188_p2) target bundleno = 898 (0x382), region = 40  ;;  %s809_s25 = smov (!%p188_p2), 111  }
   0x7   : > { %s810_s26 = smov (!%p188_p2), 113   ;;  %s811_s27 = smov (!%p188_p2), 127  }
   0x8   : > { %s812_s28 = smov (!%p188_p2), 1   ;;  %s813_s29 = smov (!%p188_p2), 15  }
   0x9   : > { %s814_s30 = smov (!%p188_p2), 16   ;;  %s815_s6 = smov (!%p188_p2), 17  }
   0xb   : > { %s1204_s19 = smov (!%p215_p3, %s747_s19), 1  ;;  %v231_v3 = vlaneseq  ;;  %v763_v7 = vld [vmem:[%s1201_s4 + $0x10] sm:$0x3]  ;;  %v762_v9 = vld [vmem:[%s1201_s4 + $0xe] sm:$0x3]  ;;  %v410_v38 = vld [vmem:[%s1199_s2] sm:$0xff] }
   0xc   : > { %s778_s20 = sshll.u32 %s1204_s19, 4  ;;  %v909_v10 = vperm.slane %v763_v7, 0  ;;  %v911_v11 = vperm.slane %v763_v7, 1  ;;  %v761_v12 = vld [vmem:[%s1201_s4 + $0xc] sm:$0x3]  ;;  %v917_v15 = vperm.slane %v762_v9, 0 }
   0xd   : > { %s219_s23 = scalar_lea.vmem %s1197_s0, %s778_s20  ;;  %v899_v6 = vand.u32 127, %v231_v3  ;;  %v919_v16 = vperm.slane %v762_v9, 1  ;;  %v931_v23 = vperm.slane %v761_v12, 0  ;;  %v933_v24 = vperm.slane %v761_v12, 1  ;;  %v760_v25 = vld [vmem:[%s1201_s4 + $0xa] sm:$0x3] }
   0xe   : > { %v863_v0 = vld [vmem:[%s219_s23] sm:$0xff]  ;;  %v871_v1 = vld [vmem:[%s219_s23 + $0x8] sm:$0xff]  ;;  %v948_v32 = vperm.slane %v760_v25, 0  ;;  %v950_v33 = vperm.slane %v760_v25, 1  ;;  %v816_v40 = vmov 0   ;;  %vm366_vm8 = vcmask 588800  }
   0xf   : > { %333 = vrot.lane.b32.xlu1 %v863_v0, %s808_s24  ;;  %349 = vrot.lane.b32.xlu0 %v863_v0, %s809_s25  ;;  %vm337_vm0 = vcmp.lt.s32.totalorder %v899_v6, 112  ;;  %vm353_vm1 = vcmp.lt.s32.totalorder %v899_v6, 111  ;;  %vm321_vm2 = vcmp.lt.s32.totalorder %v899_v6, 113  ;;  %v759_v28 = vld [vmem:[%s1201_s4 + $0x8] sm:$0x3]  ;;  %vm305_vm3 = vcmp.lt.s32.totalorder %v899_v6, 127 }
  0x10   : > { %317 = vrot.lane.b32.xlu2 %v863_v0, %s810_s26  ;;  %v954_v36 = vperm.slane %v759_v28, 0  ;;  %v956_v37 = vperm.slane %v759_v28, 1  ;;  %v418_v39 = vld [vmem:[%s1200_s3] sm:$0xff]  ;;  %797 = vset.pattern.permute.xlu1 %v816_v40  ;;  %vm280_vm4 = vcmp.lt.s32.totalorder %v899_v6, 1  ;;  %vm264_vm5 = vcmp.lt.s32.totalorder %v899_v6, 15 }
  0x11   : > { %798 = vset.pattern.permute.xlu2 %v816_v40  ;;  %v758_v49 = vld [vmem:[%s1201_s4 + $0x6] sm:$0x3]  ;;  %799 = vset.pattern.permute.xlu0 %v816_v40  ;;  %v757_v50 = vld [vmem:[%s1201_s4 + $0x4] sm:$0x3]  ;;  %vm248_vm6 = vcmp.lt.s32.totalorder %v899_v6, 16  ;;  %vm233_vm7 = vcmp.lt.s32.totalorder %v899_v6, 17 }
  0x12   : > { %v299_v47 = vmul.f32 %v954_v36, %v863_v0  ;;  %v300_v48 = vmul.f32 %v956_v37, %v871_v1  ;;  %v981_v51 = vperm.slane %v758_v49, 0  ;;  %v983_v52 = vperm.slane %v758_v49, 1 }
  0x13   : > { %v986_v54 = vperm.slane %v757_v50, 0  ;;  %v988_v55 = vperm.slane %v757_v50, 1 }
  0x17   : > { %335 = vrot.lane.b32.xlu1 %v871_v1, %s808_s24  ;;  %351 = vrot.lane.b32.xlu0 %v871_v1, %s809_s25 }
  0x18   : > { %319 = vrot.lane.b32.xlu2 %v871_v1, %s810_s26 }
  0x1f   : > { %303 = vrot.lane.b32.xlu1 %v871_v1, %s811_s27  ;;  %301 = vrot.lane.b32.xlu0 %v863_v0, %s811_s27 }
  0x20   : > { %276 = vrot.lane.b32.xlu2 %v863_v0, %s812_s28 }
  0x27   : > { %260 = vrot.lane.b32.xlu1 %v863_v0, %s813_s29  ;;  %278 = vrot.lane.b32.xlu0 %v871_v1, %s812_s28 }
  0x28   : > { %262 = vrot.lane.b32.xlu2 %v871_v1, %s813_s29 }
  0x2f   : > { %246 = vrot.lane.b32.xlu1 %v871_v1, %s814_s30  ;;  %244 = vrot.lane.b32.xlu0 %v863_v0, %s814_s30 }
  0x30   : > { %227 = vrot.lane.b32.xlu2 %v863_v0, %s815_s6 }
  0x37   : > { %229 = vrot.lane.b32.xlu0 %v871_v1, %s815_s6  ;;  %413 = vperm.xlu1 %797, %v410_v38  }
  0x38   : > { %421 = vperm.xlu2 %798, %v418_v39  }
  0x6a   : > { %v318_v2 = vpop.permute.xlu2 %317 }
  0x72   : > { %v320_v8 = vpop.permute.xlu2 %319 }
  0x73   : > { %v322_v26 = vsel %vm321_vm2, %v318_v2, %v320_v8  ;;  %v323_v27 = vsel %vm321_vm2, %v320_v8, %v318_v2  ;;  %v756_v2 = vld [vmem:[%s1201_s4 + $0x2] sm:$0x3] }
  0x74   : > { %v331_v34 = vmul.f32 %v931_v23, %v322_v26  ;;  %v332_v35 = vmul.f32 %v933_v24, %v323_v27  ;;  %v1006_v3 = vperm.slane %v756_v2, 0  ;;  %v365_v27 = vld [vmem:[%s1198_s1] sm:$0xff] }
  0x7a   : > { %v277_v31 = vpop.permute.xlu2 %276 }
  0x81   : > { %v334_v4 = vpop.permute.xlu1 %333  ;;  %v350_v5 = vpop.permute.xlu0 %349 }
  0x82   : > { %v263_v53 = vpop.permute.xlu2 %262 }
  0x89   : > { %v336_v13 = vpop.permute.xlu1 %335  ;;  %v352_v14 = vpop.permute.xlu0 %351 }
  0x8a   : > { %v338_v17 = vsel %vm337_vm0, %v334_v4, %v336_v13  ;;  %v339_v18 = vsel %vm337_vm0, %v336_v13, %v334_v4  ;;  %v354_v19 = vsel %vm353_vm1, %v350_v5, %v352_v14  ;;  %v355_v20 = vsel %vm353_vm1, %v352_v14, %v350_v5  ;;  %v236_v14 = vld [vmem:[%s1201_s4] sm:$0x3] }
  0x8b   : > { %v363_v21 = vmul.f32 %v909_v10, %v354_v19  ;;  %v364_v22 = vmul.f32 %v911_v11, %v355_v20  ;;  %v347_v29 = vmul.f32 %v917_v15, %v338_v17  ;;  %v348_v30 = vmul.f32 %v919_v16, %v339_v18  ;;  %v228_v17 = vpop.permute.xlu2 %227 }
  0x8c   : > { %v1008_v4 = vperm.slane %v756_v2, 1  ;;  %v1020_v18 = vperm.slane %v236_v14, 0  ;;  %v1022_v19 = vperm.slane %v236_v14, 1 }
  0x8d   : > { %377 = vmatpush.msra.mxu0 %v363_v21  ;;  %397 = vmatpush.msra.mxu1 %v364_v22 }
  0x8f   : > { %378 = vmatpush.msra.mxu0 %v347_v29  ;;  %398 = vmatpush.msra.mxu1 %v348_v30 }
  0x91   : > { %v304_v41 = vpop.permute.xlu1 %303  ;;  %379 = vmatpush.msra.mxu0 %v331_v34  ;;  %399 = vmatpush.msra.mxu1 %v332_v35  ;;  %v302_v42 = vpop.permute.xlu0 %301 }
  0x92   : > { %v306_v43 = vsel %vm305_vm3, %v302_v42, %v304_v41  ;;  %v307_v44 = vsel %vm305_vm3, %v304_v41, %v302_v42  ;;  %v769_v42 = vld [vmem:[%s1199_s2 + $0x8] sm:$0xff] }
  0x93   : > { %v315_v45 = vmul.f32 %v948_v32, %v306_v43  ;;  %v316_v46 = vmul.f32 %v950_v33, %v307_v44  ;;  %v422_v29 = vpop.permute.xlu2 %421  ;;  %v770_v43 = vld [vmem:[%s1200_s3 + $0x8] sm:$0xff] }
  0x95   : > { %380 = vmatpush.msra.mxu0 %v315_v45  ;;  %400 = vmatpush.msra.mxu1 %v316_v46 }
  0x97   : > { %381 = vmatpush.msra.mxu0 %v299_v47  ;;  %401 = vmatpush.msra.mxu1 %v300_v48 }
  0x99   : > { %v261_v56 = vpop.permute.xlu1 %260  ;;  %v279_v57 = vpop.permute.xlu0 %278 }
  0x9a   : > { %v281_v58 = vsel %vm280_vm4, %v277_v31, %v279_v57  ;;  %v282_v59 = vsel %vm280_vm4, %v279_v57, %v277_v31  ;;  %v265_v60 = vsel %vm264_vm5, %v261_v56, %v263_v53  ;;  %v266_v61 = vsel %vm264_vm5, %v263_v53, %v261_v56 }
  0x9b   : > { %v290_v62 = vmul.f32 %v981_v51, %v282_v59  ;;  %v291_v63 = vmul.f32 %v983_v52, %v281_v58  ;;  %v274_v0 = vmul.f32 %v986_v54, %v266_v61  ;;  %v275_v1 = vmul.f32 %v988_v55, %v265_v60 }
  0x9d   : > { %382 = vmatpush.msra.mxu0 %v290_v62  ;;  %402 = vmatpush.msra.mxu1 %v291_v63 }
  0x9f   : > { %383 = vmatpush.msra.mxu0 %v274_v0  ;;  %403 = vmatpush.msra.mxu1 %v275_v1 }
  0xa1   : > { %v247_v5 = vpop.permute.xlu1 %246  ;;  %v245_v7 = vpop.permute.xlu0 %244 }
  0xa2   : > { %v249_v8 = vsel %vm248_vm6, %v245_v7, %v247_v5  ;;  %v250_v9 = vsel %vm248_vm6, %v247_v5, %v245_v7 }
  0xa3   : > { %v258_v12 = vmul.f32 %v1006_v3, %v250_v9  ;;  %v259_v13 = vmul.f32 %v1008_v4, %v249_v8 }
  0xa5   : > { %384 = vmatpush.msra.mxu0 %v258_v12  ;;  %404 = vmatpush.msra.mxu1 %v259_v13 }
  0xa9   : > { %v230_v20 = vpop.permute.xlu0 %229  ;;  %v414_v28 = vpop.permute.xlu1 %413 }
  0xaa   : > { %v234_v21 = vsel %vm233_vm7, %v228_v17, %v230_v20  ;;  %v235_v22 = vsel %vm233_vm7, %v230_v20, %v228_v17 }
  0xab   : > { %v242_v25 = vmul.f32 %v1020_v18, %v235_v22  ;;  %v243_v26 = vmul.f32 %v1022_v19, %v234_v21 }
  0xad   : > { %385 = vmatpush.msra.mxu0 %v242_v25  ;;  %405 = vmatpush.msra.mxu1 %v243_v26 }
  0xae   : > { %764 = vmatmul.msk.f32.vlgmr.msra.gmra.mxu0 %vm366_vm8, %v365_v27  ;;  %765 = vmatmul.msk.f32.vlgmr.msra.gmra.mxu1 %vm366_vm8, %v365_v27 }
 0x12b   : > { %v387_v30 = vpop.f32.mrf.mxu0  ;;  %v407_v31 = vpop.f32.mrf.mxu1 }
 0x12c   : > { %v416_v34 = vmul.f32 %v414_v28, %v387_v30  ;;  %v417_v35 = vmul.f32 %v414_v28, %v407_v31 }
 0x12e   : > { %v424_v38 = vadd.f32 %v422_v29, %v416_v34  ;;  %v425_v39 = vadd.f32 %v422_v29, %v417_v35 }
 0x130   : > { %v426_v40 = vmax.f32 %v424_v38, 0.0  ;;  %v427_v41 = vmax.f32 %v425_v39, 0.0 }
 0x132   : > { %488 = vrot.lane.b32.xlu1 %v427_v41, %s809_s25  ;;  %478 = vrot.lane.b32.xlu2 %v426_v40, %s808_s24  ;;  %v460_v14 = vmul.f32 %v426_v40, %v954_v36  ;;  %v461_v17 = vmul.f32 %v427_v41, %v956_v37 }
 0x133   : > { %486 = vrot.lane.b32.xlu0 %v426_v40, %s809_s25 }
 0x13a   : > { %470 = vrot.lane.b32.xlu1 %v426_v40, %s810_s26  ;;  %472 = vrot.lane.b32.xlu2 %v427_v41, %s810_s26 }
 0x13b   : > { %480 = vrot.lane.b32.xlu0 %v427_v41, %s808_s24 }
 0x142   : > { %464 = vrot.lane.b32.xlu1 %v427_v41, %s811_s27  ;;  %452 = vrot.lane.b32.xlu2 %v426_v40, %s812_s28 }
 0x143   : > { %462 = vrot.lane.b32.xlu0 %v426_v40, %s811_s27 }
 0x14a   : > { %444 = vrot.lane.b32.xlu1 %v426_v40, %s813_s29  ;;  %446 = vrot.lane.b32.xlu2 %v427_v41, %s813_s29 }
 0x14b   : > { %454 = vrot.lane.b32.xlu0 %v427_v41, %s812_s28 }
 0x152   : > { %438 = vrot.lane.b32.xlu1 %v427_v41, %s814_s30  ;;  %428 = vrot.lane.b32.xlu2 %v426_v40, %s815_s6 }
 0x153   : > { %436 = vrot.lane.b32.xlu0 %v426_v40, %s814_s30 }
 0x15a   : > { %543 = vperm.xlu1 %797, %v769_v42   ;;  %552 = vperm.xlu2 %798, %v770_v43  }
 0x15b   : > { %430 = vrot.lane.b32.xlu0 %v427_v41, %s815_s6 }
 0x18c   : > { %v479_v44 = vpop.permute.xlu2 %478 }
 0x194   : > { %v473_v53 = vpop.permute.xlu2 %472 }
 0x19c   : > { %v453_v2 = vpop.permute.xlu2 %452 }
 0x1a4   : > { %v489_v45 = vpop.permute.xlu1 %488  ;;  %v447_v21 = vpop.permute.xlu2 %446 }
 0x1a5   : > { %v487_v46 = vpop.permute.xlu0 %486 }
 0x1a6   : > { %v490_v47 = vsel %vm353_vm1, %v487_v46, %v489_v45  ;;  %v491_v48 = vsel %vm353_vm1, %v489_v45, %v487_v46 }
 0x1a7   : > { %v492_v49 = vmul.f32 %v490_v47, %v909_v10  ;;  %v493_v50 = vmul.f32 %v491_v48, %v911_v11 }
 0x1a9   : > { %506 = vmatpush.msra.mxu2 %v492_v49  ;;  %526 = vmatpush.msra.mxu3 %v493_v50  ;;  %v766_v49 = vld [vmem:[%s1198_s1 + $0x8] sm:$0xff] }
 0x1ac   : > { %v471_v56 = vpop.permute.xlu1 %470  ;;  %v429_v43 = vpop.permute.xlu2 %428 }
 0x1ad   : > { %v481_v57 = vpop.permute.xlu0 %480  ;;  %v474_v58 = vsel %vm321_vm2, %v471_v56, %v473_v53  ;;  %v475_v59 = vsel %vm321_vm2, %v473_v53, %v471_v56 }
 0x1ae   : > { %v482_v60 = vsel %vm337_vm0, %v479_v44, %v481_v57  ;;  %v483_v61 = vsel %vm337_vm0, %v481_v57, %v479_v44  ;;  %v476_v0 = vmul.f32 %v474_v58, %v931_v23  ;;  %v477_v1 = vmul.f32 %v475_v59, %v933_v24 }
 0x1af   : > { %v484_v62 = vmul.f32 %v482_v60, %v917_v15  ;;  %v485_v63 = vmul.f32 %v483_v61, %v919_v16 }
 0x1b1   : > { %507 = vmatpush.msra.mxu2 %v484_v62  ;;  %527 = vmatpush.msra.mxu3 %v485_v63 }
 0x1b3   : > { %508 = vmatpush.msra.mxu2 %v476_v0  ;;  %528 = vmatpush.msra.mxu3 %v477_v1  ;;  %v774_v0 = vld [vmem:[%s1199_s2 + $0x10] sm:$0xff] }
 0x1b4   : > { %v465_v5 = vpop.permute.xlu1 %464  ;;  %v553_v59 = vpop.permute.xlu2 %552  ;;  %v775_v1 = vld [vmem:[%s1200_s3 + $0x10] sm:$0xff] }
 0x1b5   : > { %v463_v7 = vpop.permute.xlu0 %462 }
 0x1b6   : > { %v466_v8 = vsel %vm305_vm3, %v463_v7, %v465_v5  ;;  %v467_v9 = vsel %vm305_vm3, %v465_v5, %v463_v7 }
 0x1b7   : > { %v468_v12 = vmul.f32 %v466_v8, %v948_v32  ;;  %v469_v13 = vmul.f32 %v467_v9, %v950_v33 }
 0x1b9   : > { %509 = vmatpush.msra.mxu2 %v468_v12  ;;  %529 = vmatpush.msra.mxu3 %v469_v13 }
 0x1bb   : > { %510 = vmatpush.msra.mxu2 %v460_v14  ;;  %530 = vmatpush.msra.mxu3 %v461_v17 }
 0x1bc   : > { %v445_v20 = vpop.permute.xlu1 %444 }
 0x1bd   : > { %v455_v22 = vpop.permute.xlu0 %454  ;;  %v448_v25 = vsel %vm264_vm5, %v445_v20, %v447_v21  ;;  %v449_v26 = vsel %vm264_vm5, %v447_v21, %v445_v20 }
 0x1be   : > { %v456_v27 = vsel %vm280_vm4, %v453_v2, %v455_v22  ;;  %v457_v28 = vsel %vm280_vm4, %v455_v22, %v453_v2  ;;  %v450_v31 = vmul.f32 %v449_v26, %v986_v54  ;;  %v451_v34 = vmul.f32 %v448_v25, %v988_v55 }
 0x1bf   : > { %v458_v29 = vmul.f32 %v457_v28, %v981_v51  ;;  %v459_v30 = vmul.f32 %v456_v27, %v983_v52 }
 0x1c1   : > { %511 = vmatpush.msra.mxu2 %v458_v29  ;;  %531 = vmatpush.msra.mxu3 %v459_v30 }
 0x1c3   : > { %512 = vmatpush.msra.mxu2 %v450_v31  ;;  %532 = vmatpush.msra.mxu3 %v451_v34 }
 0x1c4   : > { %v439_v35 = vpop.permute.xlu1 %438 }
 0x1c5   : > { %v437_v38 = vpop.permute.xlu0 %436 }
 0x1c6   : > { %v440_v39 = vsel %vm248_vm6, %v437_v38, %v439_v35  ;;  %v441_v40 = vsel %vm248_vm6, %v439_v35, %v437_v38 }
 0x1c7   : > { %v442_v41 = vmul.f32 %v441_v40, %v1006_v3  ;;  %v443_v42 = vmul.f32 %v440_v39, %v1008_v4 }
 0x1c9   : > { %513 = vmatpush.msra.mxu2 %v442_v41  ;;  %533 = vmatpush.msra.mxu3 %v443_v42 }
 0x1cc   : > { %v544_v50 = vpop.permute.xlu1 %543 }
 0x1cd   : > { %v431_v44 = vpop.permute.xlu0 %430 }
 0x1ce   : > { %v432_v45 = vsel %vm233_vm7, %v429_v43, %v431_v44  ;;  %v433_v46 = vsel %vm233_vm7, %v431_v44, %v429_v43 }
 0x1cf   : > { %v434_v47 = vmul.f32 %v433_v46, %v1020_v18  ;;  %v435_v48 = vmul.f32 %v432_v45, %v1022_v19 }
 0x1d1   : > { %514 = vmatpush.msra.mxu2 %v434_v47  ;;  %534 = vmatpush.msra.mxu3 %v435_v48 }
 0x1d2   : > { %767 = vmatmul.msk.f32.vlgmr.msra.gmra.mxu2 %vm366_vm8, %v766_v49  ;;  %768 = vmatmul.msk.f32.vlgmr.msra.gmra.mxu3 %vm366_vm8, %v766_v49 }
 0x255   : > { %v516_v53 = vpop.f32.mrf.mxu2  ;;  %v536_v56 = vpop.f32.mrf.mxu3 }
 0x256   : > { %v546_v57 = vmul.f32 %v544_v50, %v516_v53  ;;  %v547_v58 = vmul.f32 %v544_v50, %v536_v56 }
 0x258   : > { %v555_v60 = vadd.f32 %v553_v59, %v546_v57  ;;  %v556_v61 = vadd.f32 %v553_v59, %v547_v58 }
 0x25a   : > { %v557_v62 = vmax.f32 %v555_v60, 0.0  ;;  %v558_v63 = vmax.f32 %v556_v61, 0.0 }
 0x25c   : > { %619 = vrot.lane.b32.xlu1 %v558_v63, %s809_s25  ;;  %609 = vrot.lane.b32.xlu2 %v557_v62, %s808_s24 }
 0x25d   : > { %617 = vrot.lane.b32.xlu0 %v557_v62, %s809_s25 }
 0x264   : > { %601 = vrot.lane.b32.xlu1 %v557_v62, %s810_s26  ;;  %603 = vrot.lane.b32.xlu2 %v558_v63, %s810_s26 }
 0x265   : > { %611 = vrot.lane.b32.xlu0 %v558_v63, %s808_s24 }
 0x26c   : > { %595 = vrot.lane.b32.xlu1 %v558_v63, %s811_s27  ;;  %583 = vrot.lane.b32.xlu2 %v557_v62, %s812_s28 }
 0x26d   : > { %593 = vrot.lane.b32.xlu0 %v557_v62, %s811_s27 }
 0x274   : > { %575 = vrot.lane.b32.xlu1 %v557_v62, %s813_s29  ;;  %577 = vrot.lane.b32.xlu2 %v558_v63, %s813_s29 }
 0x275   : > { %585 = vrot.lane.b32.xlu0 %v558_v63, %s812_s28 }
 0x27c   : > { %569 = vrot.lane.b32.xlu1 %v558_v63, %s814_s30  ;;  %559 = vrot.lane.b32.xlu2 %v557_v62, %s815_s6 }
 0x27d   : > { %567 = vrot.lane.b32.xlu0 %v557_v62, %s814_s30 }
 0x284   : > { %674 = vperm.xlu1 %797, %v774_v0   ;;  %683 = vperm.xlu2 %798, %v775_v1  }
 0x285   : > { %561 = vrot.lane.b32.xlu0 %v558_v63, %s815_s6  ;;  %s224_s6 = scalar_lea.vmem %s1202_s5, %s778_s20 }
 0x2b6   : > { %v610_v2 = vpop.permute.xlu2 %609 }
 0x2be   : > { %v604_v14 = vpop.permute.xlu2 %603 }
 0x2c6   : > { %v584_v29 = vpop.permute.xlu2 %583 }
 0x2ce   : > { %v620_v5 = vpop.permute.xlu1 %619  ;;  %v578_v39 = vpop.permute.xlu2 %577 }
 0x2cf   : > { %v618_v7 = vpop.permute.xlu0 %617 }
 0x2d0   : > { %v621_v8 = vsel %vm353_vm1, %v618_v7, %v620_v5  ;;  %v622_v9 = vsel %vm353_vm1, %v620_v5, %v618_v7 }
 0x2d1   : > { %v623_v12 = vmul.f32 %v621_v8, %v909_v10  ;;  %v624_v13 = vmul.f32 %v622_v9, %v911_v11 }
 0x2d3   : > { %637 = vmatpush.msrb.mxu0 %v623_v12  ;;  %657 = vmatpush.msrb.mxu1 %v624_v13 }
 0x2d6   : > { %v602_v17 = vpop.permute.xlu1 %601  ;;  %v560_v49 = vpop.permute.xlu2 %559 }
 0x2d7   : > { %v612_v20 = vpop.permute.xlu0 %611  ;;  %v605_v21 = vsel %vm321_vm2, %v602_v17, %v604_v14  ;;  %v606_v22 = vsel %vm321_vm2, %v604_v14, %v602_v17 }
 0x2d8   : > { %v613_v25 = vsel %vm337_vm0, %v610_v2, %v612_v20  ;;  %v614_v26 = vsel %vm337_vm0, %v612_v20, %v610_v2  ;;  %v607_v27 = vmul.f32 %v605_v21, %v931_v23  ;;  %v608_v28 = vmul.f32 %v606_v22, %v933_v24 }
 0x2d9   : > { %v615_v10 = vmul.f32 %v613_v25, %v917_v15  ;;  %v616_v11 = vmul.f32 %v614_v26, %v919_v16  ;;  %v591_v23 = vmul.f32 %v557_v62, %v954_v36  ;;  %v592_v24 = vmul.f32 %v558_v63, %v956_v37 }
 0x2db   : > { %638 = vmatpush.msrb.mxu0 %v615_v10  ;;  %658 = vmatpush.msrb.mxu1 %v616_v11 }
 0x2dd   : > { %639 = vmatpush.msrb.mxu0 %v607_v27  ;;  %659 = vmatpush.msrb.mxu1 %v608_v28 }
 0x2de   : > { %v596_v30 = vpop.permute.xlu1 %595  ;;  %v684_v60 = vpop.permute.xlu2 %683 }
 0x2df   : > { %v594_v31 = vpop.permute.xlu0 %593 }
 0x2e0   : > { %v597_v34 = vsel %vm305_vm3, %v594_v31, %v596_v30  ;;  %v598_v35 = vsel %vm305_vm3, %v596_v30, %v594_v31 }
 0x2e1   : > { %v599_v15 = vmul.f32 %v597_v34, %v948_v32  ;;  %v600_v16 = vmul.f32 %v598_v35, %v950_v33 }
 0x2e3   : > { %640 = vmatpush.msrb.mxu0 %v599_v15  ;;  %660 = vmatpush.msrb.mxu1 %v600_v16 }
 0x2e5   : > { %641 = vmatpush.msrb.mxu0 %v591_v23  ;;  %661 = vmatpush.msrb.mxu1 %v592_v24 }
 0x2e6   : > { %v576_v38 = vpop.permute.xlu1 %575 }
 0x2e7   : > { %v586_v40 = vpop.permute.xlu0 %585  ;;  %v579_v41 = vsel %vm264_vm5, %v576_v38, %v578_v39  ;;  %v580_v42 = vsel %vm264_vm5, %v578_v39, %v576_v38 }
 0x2e8   : > { %v587_v32 = vsel %vm280_vm4, %v584_v29, %v586_v40  ;;  %v588_v33 = vsel %vm280_vm4, %v586_v40, %v584_v29  ;;  %v581_v43 = vmul.f32 %v580_v42, %v986_v54  ;;  %v582_v44 = vmul.f32 %v579_v41, %v988_v55 }
 0x2e9   : > { %v589_v36 = vmul.f32 %v588_v33, %v981_v51  ;;  %v590_v37 = vmul.f32 %v587_v32, %v983_v52 }
 0x2eb   : > { %642 = vmatpush.msrb.mxu0 %v589_v36  ;;  %662 = vmatpush.msrb.mxu1 %v590_v37 }
 0x2ed   : > { %643 = vmatpush.msrb.mxu0 %v581_v43  ;;  %663 = vmatpush.msrb.mxu1 %v582_v44 }
 0x2ee   : > { %v570_v45 = vpop.permute.xlu1 %569 }
 0x2ef   : > { %v568_v46 = vpop.permute.xlu0 %567 }
 0x2f0   : > { %v571_v47 = vsel %vm248_vm6, %v568_v46, %v570_v45  ;;  %v572_v48 = vsel %vm248_vm6, %v570_v45, %v568_v46 }
 0x2f1   : > { %v573_v51 = vmul.f32 %v572_v48, %v1006_v3  ;;  %v574_v52 = vmul.f32 %v571_v47, %v1008_v4  ;;  %v771_v3 = vld [vmem:[%s1198_s1 + $0x10] sm:$0xff] }
 0x2f3   : > { %644 = vmatpush.msrb.mxu0 %v573_v51  ;;  %664 = vmatpush.msrb.mxu1 %v574_v52 }
 0x2f6   : > { %v675_v4 = vpop.permute.xlu1 %674 }
 0x2f7   : > { %v562_v54 = vpop.permute.xlu0 %561 }
 0x2f8   : > { %v563_v55 = vsel %vm233_vm7, %v560_v49, %v562_v54  ;;  %v564_v50 = vsel %vm233_vm7, %v562_v54, %v560_v49 }
 0x2f9   : > { %v565_v53 = vmul.f32 %v564_v50, %v1020_v18  ;;  %v566_v56 = vmul.f32 %v563_v55, %v1022_v19 }
 0x2fb   : > { %645 = vmatpush.msrb.mxu0 %v565_v53  ;;  %665 = vmatpush.msrb.mxu1 %v566_v56 }
 0x2fc   : > { %772 = vmatmul.msk.f32.vlgmr.msrb.gmra.mxu0 %vm366_vm8, %v771_v3  ;;  %773 = vmatmul.msk.f32.vlgmr.msrb.gmra.mxu1 %vm366_vm8, %v771_v3 }
 0x379   : > { %v647_v57 = vpop.f32.mrf.mxu0  ;;  %v667_v58 = vpop.f32.mrf.mxu1 }
 0x37a   : > { %v677_v6 = vmul.f32 %v675_v4, %v647_v57  ;;  %v678_v59 = vmul.f32 %v675_v4, %v667_v58 }
 0x37c   : > { %v686_v61 = vadd.f32 %v684_v60, %v677_v6  ;;  %v687_v18 = vadd.f32 %v684_v60, %v678_v59 }
 0x37e   : > { %v688_v19 = vmax.f32 %v686_v61, 0.0  ;;  %v689_v62 = vmax.f32 %v687_v18, 0.0 }
 0x380   : > { %690 = vst [vmem:[%s224_s6] sm:$0xff] %v688_v19 }
 0x381   : > { %691 = vst [vmem:[%s224_s6 + $0x8] sm:$0xff] %v689_v62 }
 0x382 PF: > { %s15_s18 = sadd.s32 1, %s806_s18  }
 0x383   : > { %p12_p4 = scmp.ge.s32.totalorder %s15_s18, 4  }
 0x385   :  { %14 = sbr.rel (!%p12_p4) target bundleno = 1 (0x1), region = 84 }

</bundles_post_ra>
